<compile_context>
chip_gen: v6e
topology: v6e:2x2x1
jax: 0.10.0
libtpu: 0.0.40
codegen_flags: <defaults>
</compile_context>

<pallas_src>
import functools
import math

import jax
import jax.numpy as jnp
from jax.experimental import pallas as pl
from jax.experimental.pallas import tpu as pltpu


def _round_up(x, m):
    return (x + m - 1) // m * m


def _fourier_kernel(x_ref, e_ref, p_ref, o_ref, *, weighted):
    # x_ref: (TMR, IN)   packed coordinates, f32 (P points per row)
    # e_ref: (3*IN, W)   bf16 0/1 lane-replication matrix, stacked for hi/mid/lo
    # p_ref: (K, W)      f32 per-lane constants: row0 = scale (pi * 2**f),
    #                    row1 = phase (0 on sin lanes, pi/2 on cos lanes),
    #                    row2 = coarse-to-fine weight (only when weighted)
    # o_ref: (TMR, W)    lane-dense packed output, W = P * 2 * d * num_basis
    x = x_ref[...]

    # Exact 3-way bf16 split: x == hi + mid + lo with every chunk (and every
    # partial sum) f32-representable, so the single stacked-K bf16 MXU matmul
    # below reproduces the f32 gather bit-exactly.
    x_hi = x.astype(jnp.bfloat16)
    r = x - x_hi.astype(jnp.float32)
    x_mid = r.astype(jnp.bfloat16)
    x_lo = (r - x_mid.astype(jnp.float32)).astype(jnp.bfloat16)
    xs = jnp.concatenate([x_hi, x_mid, x_lo], axis=-1)            # (TMR, 3*IN) bf16

    xg = jnp.dot(xs, e_ref[...], preferred_element_type=jnp.float32)   # (TMR, W)

    # Single transcendental per lane: cos lanes use sin(a + pi/2).  The fl(pi/2)
    # rounding introduces <= ~1.2e-7 absolute error, far below test tolerance.
    a = xg * p_ref[0:1, :] + p_ref[1:2, :]
    s = jnp.sin(a)
    if weighted:
        s = p_ref[2:3, :] * s
    o_ref[...] = s.astype(o_ref.dtype)                            # one dense store


def fourier_feature_transform(x, num_basis, max_log_scale=6,
                              fine_iterations=None, n_iter=None,
                              out_dtype=jnp.float32,
                              target_block_bytes=1 * 1024 * 1024):
    """x: (..., D) -> (..., 2 * D * num_basis), matching the torch module."""
    orig_shape = x.shape
    d = int(orig_shape[-1])
    m = math.prod(orig_shape[:-1])
    out_d = 2 * d * num_basis

    x2 = x.reshape(m, d).astype(jnp.float32)

    # ---- frequencies and coarse-to-fine weights (tiny, static glue) --------
    freqs = jnp.linspace(0.0, float(max_log_scale), num_basis, dtype=jnp.float32)
    scales = (2.0 ** freqs) * jnp.float32(math.pi)                # (num_basis,)
    weighted = fine_iterations is not None and n_iter is not None
    if weighted:
        k = jnp.arange(num_basis, dtype=jnp.float32)
        alpha = jnp.float32(n_iter / fine_iterations * num_basis)
        running_weight = (1.0 - jnp.cos(
            jnp.clip(alpha - k, 0.0, 1.0) * jnp.float32(math.pi))) / 2.0
        running_weight = running_weight.astype(jnp.float32)
    else:
        running_weight = None   # plain path: weight == 1, skip the multiply

    # ---- lane-dense packing --------------------------------------------------
    pack = 128 // math.gcd(out_d, 128)    # smallest P with P*out_d % 128 == 0
    w_lanes = pack * out_d                # packed output row width (mult. of 128)
    in_lanes = pack * d                   # packed input row width

    # Per-lane constants and the stacked 0/1 replication matrix.
    j = jnp.arange(w_lanes)
    p_idx = j // out_d                    # which of the P packed points
    q_idx = j % out_d                     # feature offset inside one point
    b_idx = q_idx // (2 * d)              # basis index
    t_idx = (q_idx % (2 * d)) // d        # 0 -> sin block, 1 -> cos block
    c_idx = q_idx % d                     # coordinate index
    src = p_idx * d + c_idx               # source lane in packed input row
    emat = (src[None, :] == jnp.arange(in_lanes)[:, None]).astype(jnp.bfloat16)
    e3 = jnp.concatenate([emat, emat, emat], axis=0)              # (3*IN, W) bf16

    scale_vec = scales[b_idx].astype(jnp.float32)
    phase_vec = jnp.where(t_idx == 1, jnp.float32(math.pi / 2.0),
                          jnp.float32(0.0))
    if weighted:
        params = jnp.stack([scale_vec, phase_vec,
                            running_weight[b_idx].astype(jnp.float32)])
    else:
        params = jnp.stack([scale_vec, phase_vec])
    params = params.astype(jnp.float32)                           # (K, W)
    n_params = int(params.shape[0])

    # ---- tiling (rows = packed rows, each covering `pack` points) ----------
    out_itemsize = jnp.dtype(out_dtype).itemsize
    rows = pl.cdiv(m, pack)
    # Per-row VMEM estimate: double-buffered in/out blocks + bf16 split chunks
    # + ~3 full-width f32 intermediates (xg, a, sin result).
    row_bytes = 20 * in_lanes + (12 + 2 * out_itemsize) * w_lanes
    tmr = max(8, (target_block_bytes // row_bytes) // 8 * 8)
    tmr = min(tmr, 1024)                  # tile-size curves saturate ~512-1024 rows
    # Keep >= 2 (ideally 4) grid steps when rows allow, so the "parallel" grid
    # axis can actually be sharded across TensorCores (megacore / v7x 2 TCs).
    want_steps = 4 if rows >= 32 else (2 if rows >= 16 else 1)
    tmr = min(tmr, max(8, _round_up(pl.cdiv(rows, want_steps), 8)))
    tmr = min(tmr, _round_up(rows, 8))
    n_steps = pl.cdiv(rows, tmr)
    tmr = _round_up(pl.cdiv(rows, n_steps), 8)    # rebalance to cut padding
    rows_pad = n_steps * tmr
    m_pad = rows_pad * pack

    if m_pad != m:
        x2 = jnp.pad(x2, ((0, m_pad - m), (0, 0)))
    xp = x2.reshape(rows_pad, in_lanes)           # free row-major view

    cost = pl.CostEstimate(
        flops=int(rows_pad * (2 * 3 * in_lanes * w_lanes
                              + (3 if weighted else 2) * w_lanes)),
        transcendentals=int(rows_pad * w_lanes),
        bytes_accessed=int(4 * rows_pad * in_lanes
                           + out_itemsize * rows_pad * w_lanes
                           + 2 * 3 * in_lanes * w_lanes
                           + 4 * n_params * w_lanes),
    )

    kernel = functools.partial(_fourier_kernel, weighted=weighted)

    out = pl.pallas_call(
        kernel,
        out_shape=jax.ShapeDtypeStruct((rows_pad, w_lanes), out_dtype),
        grid=(n_steps,),
        in_specs=[
            pl.BlockSpec((tmr, in_lanes), lambda i: (i, 0)),            # x (packed)
            pl.BlockSpec((3 * in_lanes, w_lanes), lambda i: (0, 0)),    # E3 (bf16)
            pl.BlockSpec((n_params, w_lanes), lambda i: (0, 0)),        # scale/phase/w
        ],
        out_specs=pl.BlockSpec((tmr, w_lanes), lambda i: (i, 0)),
        compiler_params=pltpu.CompilerParams(
            dimension_semantics=("parallel",),
            vmem_limit_bytes=32 * 1024 * 1024,
        ),
        cost_estimate=cost,
    )(xp, e3, params)

    out = out.reshape(m_pad, out_d)[:m]           # free view + trim padding
    return out.reshape(*orig_shape[:-1], out_d)


def _reference(x, num_basis, max_log_scale=6, fine_iterations=None, n_iter=None):
    freqs = jnp.linspace(0.0, float(max_log_scale), num_basis, dtype=jnp.float32)
    if fine_iterations is not None and n_iter is not None:
        k = jnp.arange(num_basis, dtype=jnp.float32)
        alpha = jnp.float32(n_iter / fine_iterations * num_basis)
        w = (1.0 - jnp.cos(jnp.clip(alpha - k, 0.0, 1.0) * jnp.float32(math.pi))) / 2.0
    else:
        w = jnp.ones((num_basis,), dtype=jnp.float32)
    outs = []
    for i in range(num_basis):
        arg = (2.0 ** freqs[i]) * jnp.float32(math.pi) * x
        outs.append(w[i] * jnp.concatenate([jnp.sin(arg), jnp.cos(arg)], axis=-1))
    return jnp.concatenate(outs, axis=-1)


if __name__ == "__main__":
    key = jax.random.PRNGKey(0)
    # Small NeRF-like input: batch of rays with D=4 coordinate features.
    B, N_PTS, D = 2, 64, 4
    NUM_BASIS = 4
    FINE_ITERS = 8
    N_ITER = 3

    x = jax.random.uniform(key, (B, N_PTS, D), dtype=jnp.float32,
                           minval=-1.0, maxval=1.0)

    # Coarse-to-fine scheduled path (weighted kernel variant).
    out = fourier_feature_transform(x, NUM_BASIS, max_log_scale=6,
                                    fine_iterations=FINE_ITERS, n_iter=N_ITER)
    out = jax.block_until_ready(out)
    ref = _reference(x, NUM_BASIS, max_log_scale=6,
                     fine_iterations=FINE_ITERS, n_iter=N_ITER)
    assert out.shape == (B, N_PTS, 2 * D * NUM_BASIS)
    assert jnp.allclose(out, ref, atol=2e-5, rtol=2e-5)

    # Plain path (running_weight == 1): weight multiply is skipped in-kernel.
    out2 = jax.block_until_ready(fourier_feature_transform(x, NUM_BASIS))
    ref2 = _reference(x, NUM_BASIS)
    assert jnp.allclose(out2, ref2, atol=2e-5, rtol=2e-5)

    print("KERNEL_OK")
</pallas_src>

<mosaic_0001>
module attributes {stable_mosaic.version = 11 : i64} {
  func.func @_fourier_kernel(%arg0: i32, %arg1: memref<8x16xf32, #tpu.memory_space<vmem>>, %arg2: memref<48x128xbf16, #tpu.memory_space<vmem>>, %arg3: memref<3x128xf32, #tpu.memory_space<vmem>>, %arg4: memref<8x128xf32, #tpu.memory_space<vmem>>) attributes {dimension_semantics = [#tpu.dimension_semantics<parallel>], iteration_bounds = array<i64: 4>, scalar_prefetch = 0 : i64, scratch_operands = 0 : i64, tpu.core_type = #tpu.core_type<tc>, window_params = [{transform_indices = @transform_0, window_bounds = array<i64: 8, 16>}, {pipeline_mode = #tpu.pipeline_mode<synchronous>, transform_indices = @transform_1, window_bounds = array<i64: 48, 128>}, {pipeline_mode = #tpu.pipeline_mode<synchronous>, transform_indices = @transform_2, window_bounds = array<i64: 3, 128>}, {transform_indices = @transform_3, window_bounds = array<i64: 8, 128>}]} {
    %c0 = arith.constant 0 : index
    %c0_0 = arith.constant 0 : index
    %0 = vector.load %arg1[%c0, %c0_0] : memref<8x16xf32, #tpu.memory_space<vmem>>, vector<8x16xf32>
    %1 = arith.truncf %0 : vector<8x16xf32> to vector<8x16xbf16>
    %2 = arith.extf %1 : vector<8x16xbf16> to vector<8x16xf32>
    %3 = arith.subf %0, %2 : vector<8x16xf32>
    %4 = arith.truncf %3 : vector<8x16xf32> to vector<8x16xbf16>
    %5 = arith.extf %4 : vector<8x16xbf16> to vector<8x16xf32>
    %6 = arith.subf %3, %5 : vector<8x16xf32>
    %7 = arith.truncf %6 : vector<8x16xf32> to vector<8x16xbf16>
    %8 = tpu.concatenate %1, %4, %7 in 1 : vector<8x16xbf16>, vector<8x16xbf16>, vector<8x16xbf16> -> vector<8x48xbf16>
    %c0_1 = arith.constant 0 : index
    %c0_2 = arith.constant 0 : index
    %9 = vector.load %arg2[%c0_1, %c0_2] : memref<48x128xbf16, #tpu.memory_space<vmem>>, vector<48x128xbf16>
    %cst = arith.constant dense<0.000000e+00> : vector<8x128xf32>
    %10 = tpu.matmul %8, %9, %cst {dimension_numbers = #tpu.dot_dimension_numbers<[1], [0], [0], [1], [0, 0, 1, 1], [], []>} : vector<8x48xbf16>, vector<48x128xbf16>, vector<8x128xf32> -> vector<8x128xf32>
    %c0_3 = arith.constant 0 : index
    %c0_4 = arith.constant 0 : index
    %11 = vector.load %arg3[%c0_3, %c0_4] : memref<3x128xf32, #tpu.memory_space<vmem>>, vector<1x128xf32>
    %12 = vector.broadcast %11 : vector<1x128xf32> to vector<8x128xf32>
    %13 = arith.mulf %10, %12 : vector<8x128xf32>
    %c1 = arith.constant 1 : index
    %c0_5 = arith.constant 0 : index
    %14 = vector.load %arg3[%c1, %c0_5] : memref<3x128xf32, #tpu.memory_space<vmem>>, vector<1x128xf32>
    %15 = vector.broadcast %14 : vector<1x128xf32> to vector<8x128xf32>
    %16 = arith.addf %13, %15 : vector<8x128xf32>
    %17 = math.sin %16 : vector<8x128xf32>
    %c2 = arith.constant 2 : index
    %c0_6 = arith.constant 0 : index
    %18 = vector.load %arg3[%c2, %c0_6] : memref<3x128xf32, #tpu.memory_space<vmem>>, vector<1x128xf32>
    %19 = vector.broadcast %18 : vector<1x128xf32> to vector<8x128xf32>
    %20 = arith.mulf %19, %17 : vector<8x128xf32>
    %c0_7 = arith.constant 0 : index
    %c0_8 = arith.constant 0 : index
    %21 = vector.load %arg4[%c0_7, %c0_8] : memref<8x128xf32, #tpu.memory_space<vmem>>, vector<8x128xf32>
    tpu.vector_store %arg4[%c0_7, %c0_8], %20 {strides = array<i32>} : memref<8x128xf32, #tpu.memory_space<vmem>>, vector<8x128xf32>,
    return
  }
  func.func @transform_0(%arg0: i32) -> (i32, i32) {
    %c0_i32 = arith.constant 0 : i32
    %c0_i32_0 = arith.constant 0 : i32
    return %arg0, %c0_i32 : i32, i32
  }
  func.func @transform_1(%arg0: i32) -> (i32, i32) {
    %c0_i32 = arith.constant 0 : i32
    %c0_i32_0 = arith.constant 0 : i32
    %c0_i32_1 = arith.constant 0 : i32
    return %c0_i32, %c0_i32_0 : i32, i32
  }
  func.func @transform_2(%arg0: i32) -> (i32, i32) {
    %c0_i32 = arith.constant 0 : i32
    %c0_i32_0 = arith.constant 0 : i32
    %c0_i32_1 = arith.constant 0 : i32
    return %c0_i32, %c0_i32_0 : i32, i32
  }
  func.func @transform_3(%arg0: i32) -> (i32, i32) {
    %c0_i32 = arith.constant 0 : i32
    %c0_i32_0 = arith.constant 0 : i32
    return %arg0, %c0_i32 : i32, i32
  }
}

</mosaic_0001>

<bundles_post_ra>
// kernel: tpu_custom_call.1
= control target key start
LH: loop header
LB: loop body
LE: loop exit
PB: predicated region body
PF: predicated region fallthrough
CT: control target
= control target key end

     0   :  { %8 = vsyncpa [#allocation3], 0  ;;  %s765_s0 = inlined_call_operand.vmem [shape: f32[32,16], index: 0, kind: input, shape index: {}]   ;;  %s766_s1 = inlined_call_operand.vmem [shape: bf16[48,128], index: 1, kind: input, shape index: {}]   ;;  %s767_s2 = inlined_call_operand.vmem [shape: f32[3,128], index: 2, kind: input, shape index: {}]   ;;  %s768_s3 = inlined_call_operand.hbm [shape: f32[32,128], index: 3, kind: output, shape index: {}]  }
   0x1   :  { %10 = vsyncpa [#allocation3 + $0x1], 0  ;;  %s639_s12 = smov 0   ;;  %s641_s13 = smov 0  }
   0x2   :  { %s643_s14 = smov 0   ;;  %s645_s15 = smov 0  }
   0x3 LB: > { %s660_s16 = sadd.s32 4294967295, %s606_s15   ;;  %s451_s17 = sadd.s32 4294967294, %s606_s15   ;;  %s606_s15 = sphi %s645_s15, %s774_s15   ;;  %s602_s14 = sphi %s643_s14, %s773_s14   ;;  %s598_s13 = sphi %s641_s13, %s772_s13   ;;  %s594_s12 = sphi %s639_s12, %s771_s12  }
   0x4   : > { %s664_s18 = sadd.s32 1, %s606_s15   ;;  %s91_s19 = sadd.s32 1, %s602_s14 }
   0x5   : > { %s88_s20 = ssub.s32 %s606_s15, %s664_s18  ;;  %p101_p0 = scmp.ne.s32.totalorder %s602_s14, %s598_s13 }
   0x6   : > { %p89_p1 = scmp.eq.s32.totalorder %s88_s20, 0  ;;  %p102_p2 = scmp.eq.s32.totalorder %s660_s16, 3 }
   0x7   : > { %p107_p3 = scmp.ne.s32.totalorder %s598_s13, %s594_s12  ;;  %p108_p4 = scmp.eq.s32.totalorder %s451_s17, 3 }
   0x8   : > { %s675_s21 = scalar_select %p89_p1, %s602_s14, %s91_s19  }
   0x9   : > { %p677_p5 = por %p102_p2, %p101_p0  ;;  %p681_p6 = por %p108_p4, %p107_p3 }
   0xa   : > { %p454_p7 = scmp.ge.s32.totalorder %s606_s15, 1  ;;  %p139_p8 = scmp.lt.s32.totalorder %s606_s15, 5 }
   0xc   : > { %p140_p9 = pnand %p454_p7, %p139_p8 }
   0xd   : > { %p162_p10 = scmp.lt.s32.totalorder (!%p140_p9), %s660_s16, 3  ;;  %s610_s8 = smov (!%p140_p9), 16  }
   0xe   : > { %143 = sbr.rel (%p140_p9) target bundleno = 448 (0x1c0), region = 32  ;;  %s611_s9 = smov (!%p140_p9), 32  }
   0xf   : > { %s159_s20 = sand.u32 (!%p140_p9), 1, %s598_s13   ;;  %s469_s27 = sshll.u32 (!%p140_p9), %s660_s16, 7 }
  0x10   : > { %s455_s24 = sshll.u32 (!%p140_p9), %s159_s20, 3  ;;  %s379_s6 = scalar_lea.sflag (!%p140_p9), [#allocation3], %s159_s20 }
  0x11   : > { %s161_s28 = scalar_lea.vmem (!%p140_p9), [#allocation2], %s455_s24 }
  0x13   : > { %v539_v0 = vld [vmem:[%s766_s1 + $0x10] sm:$0xff]   ;;  %v608_v1 = vmov 0.0   ;;  %s163_s26 = scalar_select %p162_p10, %s660_s16, 3  ;;  %v540_v2 = vld [vmem:[%s766_s1 + $0x8] sm:$0xff]   ;;  %v541_v4 = vld [vmem:[%s766_s1] sm:$0xff]   ;;  %vm609_vm0 = vmmov 0  }
  0x14   : > { %476 = vmatprep.subr.bf16.mxu0 %v608_v1  ;;  %482 = vmatprep.mubr.msk.bf16.mxu0 %vm609_vm0, %v608_v1  ;;  %vm181_vm1 = vcmask 130048   ;;  %vm185_vm2 = vcmask 261120   ;;  %vm212_vm3 = vcmask 392192   ;;  %v461_v16 = vld [vmem:[%s767_s2] ss:$0 sm:$0xff]  ;;  %s618_s16 = smov [#allocation2]  }
  0x15   : > { %477 = vmatpush3.bf16.msra.mxu0 %v539_v0  ;;  %s456_s29 = sshll.u32 %s163_s26, 3  ;;  %v462_v18 = vld [vmem:[%s767_s2 + $0x1] ss:$0 sm:$0xff]  ;;  %v612_v34 = vmov 683565275  }
  0x16   : > { %478 = vmatprep.subr.bf16.mxu0 %v608_v1  ;;  %s165_s5 = scalar_lea.vmem %s765_s0, %s456_s29  ;;  %v613_v36 = vmov 2475754826   ;;  %v614_v39 = vmov 2131351028   ;;  %v615_v42 = vmov 2102212464  }
  0x17   : > { %v167_v3 = vld [vmem:[%s165_s5] sm:$0xff]  ;;  %v616_v45 = vmov 920167782   ;;  %v617_v48 = vmov 1326507024   ;;  %s392_s29 = sshll.u32 %s161_s28, 4  ;;  %s390_s5 = scalar_lea.hbm %s768_s3, %s469_s27  ;;  %s393_s29 = int_to_ptr.vmem [resolvable:$true] %s392_s29 }
  0x18   : > { %v168_v5 = vpack.c.bf16 %v167_v3, %v167_v3  ;;  %s546_s7 = scalar_lea.vmem %s393_s29, 128 }
  0x19   : > { %479 = vmatpush3.bf16.msra.mxu0 %v540_v2  ;;  %p547_p11 = scmp.ne.s32.totalorder %s393_s29, %s546_s7 }
  0x1a   : > { %480 = vmatprep.subr.bf16.mxu0 %v608_v1  ;;  %v169_v6 = vunpack.c.l.bf16 %v168_v5 }
  0x1b   : > { %p548_p12 = pnand %p547_p11, %p677_p5 }
  0x1c   : > { %v170_v7 = vsub.f32 %v167_v3, %v169_v6 }
  0x1d   : > { %481 = vmatpush3.bf16.msra.mxu0 %v541_v4  ;;  %p549_p13 = pneg %p548_p12 }
  0x1e   : > { %v171_v8 = vpack.c.bf16 %v170_v7, %v170_v7 }
  0x20   : > { %176 = vrot.lane.b32.xlu0 %v171_v8, %s610_s8  ;;  %v172_v9 = vunpack.c.l.bf16 %v171_v8  ;;  %s550_s8 = sshll.u32 %s618_s16, 4  ;;  %s551_s8 = int_to_ptr.vmem [resolvable:$false] %s550_s8 }
  0x21   : > { %p553_p0 = scmp.lt.s32.totalorder %s393_s29, %s551_s8 }
  0x22   : > { %v173_v10 = vsub.f32 %v170_v7, %v172_v9 }
  0x24   : > { %v174_v11 = vpack.c.bf16 %v173_v10, %v173_v10 }
  0x26   : > { %179 = vrot.lane.b32.xlu0 %v174_v11, %s611_s9  ;;  %s552_s9 = scalar_lea.vmem %s551_s8, 256 }
  0x27   : > { %p554_p1 = scmp.lt.s32.totalorder %s552_s9, %s546_s7 }
  0x29   : > { %p555_p2 = por %p554_p1, %p553_p0 }
  0x2b   : > { %p556_p3 = pnand %p555_p2, %p549_p13 }
  0x92   : > { %v177_v12 = vpop.permute.xlu0 %176 }
  0x93   : > { %v184_v13 = vsel %vm181_vm1, %v168_v5, %v177_v12 }
  0x98   : > { %v180_v14 = vpop.permute.xlu0 %179 }
  0x99   : > { %v187_v15 = vsel %vm185_vm2, %v184_v13, %v180_v14 }
  0x9a   : > { %483 = vmatmul.mubr.msk.bf16.vlgmr.msra.gmra.mxu0 %vm212_vm3, %v187_v15 }
 0x15a   : > { %v249_v17 = vpop.f32.mrf.mxu0 }
 0x15b   : > { %v260_v19 = vmul.f32 %v461_v16, %v249_v17 }
 0x15c   : > { %v484_v20 = vpop.f32.mrf.mxu0 }
 0x15d   : > { %v707_v21 = vadd.f32 %v462_v18, %v260_v19 }
 0x15e   : > { %v252_v22 = vpop.f32.mrf.mxu0 }
 0x15f   : > { %v270_v23 = vand.u32 2139095040, %v707_v21  ;;  %v267_v28 = vand.u32 2147483647, %v707_v21  ;;  %vm269_vm11 = vcmp.lt.s32.totalorder %v707_v21, 0  ;;  %vm359_vm0 = vweird.f32 %v707_v21 }
 0x160   : > { %v485_v24 = vpop.f32.mrf.mxu0 }
 0x161   : > { %v271_v25 = vshrl.u32 %v270_v23, 23  ;;  %v274_v31 = vand.u32 8388607, %v267_v28  ;;  %vm268_vm12 = vcmp.le.f32.partialorder %v267_v28, 0.7853982 }
 0x163   : > { %v463_v26 = vadd.s32 4294967169, %v271_v25  ;;  %v275_v50 = vor.u32 8388608, %v274_v31 }
 0x165   : > { %v277_v27 = vadd.s32 1, %v463_v26  ;;  %v315_v0 = vshll.u32 %v275_v50, 8  ;;  %v467_v50 = vld [vmem:[%s767_s2 + $0x2] ss:$0 sm:$0xff] }
 0x167   : > { %vm278_vm4 = vcmp.gt.s32.totalorder %v277_v27, 0 }
 0x168   : > { %v279_v29 = vsel %vm278_vm4, %v277_v27, 0 }
 0x169   : > { %v281_v30 = vand.u32 31, %v279_v29  ;;  %v280_v33 = vshrl.u32 %v279_v29, 5 }
 0x16b   : > { %v282_v32 = vsub.s32 32, %v281_v30  ;;  %v284_v35 = vshll.u32 %v612_v34, %v281_v30  ;;  %v287_v37 = vshll.u32 %v613_v36, %v281_v30  ;;  %v290_v41 = vshll.u32 %v614_v39, %v281_v30 }
 0x16c   : > { %v293_v44 = vshll.u32 %v615_v42, %v281_v30  ;;  %v296_v47 = vshll.u32 %v616_v45, %v281_v30  ;;  %vm299_vm5 = vcmp.lt.s32.totalorder %v280_v33, 1  ;;  %vm302_vm6 = vcmp.lt.s32.totalorder %v280_v33, 4 }
 0x16d   : > { %v285_v38 = vshrl.u32 %v613_v36, %v282_v32  ;;  %v288_v40 = vshrl.u32 %v614_v39, %v282_v32  ;;  %v291_v43 = vshrl.u32 %v615_v42, %v282_v32  ;;  %v294_v46 = vshrl.u32 %v616_v45, %v282_v32 }
 0x16e   : > { %v297_v49 = vshrl.u32 %v617_v48, %v282_v32  ;;  %v283_v59 = vshrl.u32 %v612_v34, %v282_v32  ;;  %vm301_vm7 = vcmp.lt.s32.totalorder %v280_v33, 3  ;;  %vm300_vm8 = vcmp.lt.s32.totalorder %v280_v33, 2 }
 0x16f   : > { %v286_v51 = vor.u32 %v285_v38, %v284_v35  ;;  %v289_v52 = vor.u32 %v288_v40, %v287_v37  ;;  %v292_v53 = vor.u32 %v291_v43, %v290_v41  ;;  %v295_v54 = vor.u32 %v294_v46, %v293_v44 }
 0x170   : > { %v298_v55 = vor.u32 %v297_v49, %v296_v47 }
 0x171   : > { %v304_v56 = vsel %vm302_vm6, %v292_v53, 2102212464  ;;  %v307_v57 = vsel %vm299_vm5, %v286_v51, %v289_v52  ;;  %v311_v58 = vsel %vm299_vm5, %v289_v52, %v292_v53  ;;  %v308_v60 = vsel %vm302_vm6, %v295_v54, 920167782 }
 0x172   : > { %v312_v61 = vsel %vm302_vm6, %v298_v55, 1326507024  ;;  %v309_v62 = vsel %vm301_vm7, %v292_v53, %v308_v60  ;;  %v303_v1 = vsel %vm299_vm5, %v283_v59, %v286_v51  ;;  %v305_v2 = vsel %vm301_vm7, %v289_v52, %v304_v56 }
 0x173   : > { %v313_v63 = vsel %vm301_vm7, %v295_v54, %v312_v61  ;;  %v310_v3 = vsel %vm300_vm8, %v307_v57, %v309_v62  ;;  %v306_v9 = vsel %vm300_vm8, %v303_v1, %v305_v2 }
 0x174   : > { %v314_v4 = vsel %vm300_vm8, %v311_v58, %v313_v63  ;;  %v716_v7 = vmul.u32.u64.low %v315_v0, %v310_v3  ;;  %v717_v8 = vmul.u32.u64.high %v315_v0, %v310_v3, %v716_v7  ;;  %v322_v11 = vmul.u32 %v315_v0, %v306_v9 }
 0x175   : > { %v713_v5 = vmul.u32.u64.low %v315_v0, %v314_v4  ;;  %v714_v6 = vmul.u32.u64.high %v315_v0, %v314_v4, %v713_v5 }
 0x176   : > { %v325_v10 = vadd.s32 1, %v717_v8 }
 0x177   : > { %vm324_vm9 = vc.u32 %v714_v6, %v716_v7  ;;  %v323_v24 = vadd.s32 %v716_v7, %v714_v6 }
 0x178   : > { %v326_v12 = vsel %vm324_vm9, %v325_v10, %v717_v8 }
 0x179   : > { %v327_v13 = vadd.s32 %v326_v12, %v322_v11 }
 0x17b   : > { %v328_v14 = vadd.s32 536870912, %v327_v13 }
 0x17d   : > { %v329_v15 = vshrl.u32 %v328_v14, 30 }
 0x17f   : > { %v330_v16 = vshll.u32 %v329_v15, 30  ;;  %v353_v38 = vsub.s32 4, %v329_v15 }
 0x181   : > { %v331_v17 = vsub.s32 %v327_v13, %v330_v16  ;;  %v354_v41 = vsel %vm269_vm11, %v353_v38, %v329_v15 }
 0x182   : > { %v356_v42 = vsel %vm268_vm12, 0, %v354_v41 }
 0x183   : > { %v333_v18 = vsub.s32 0, %v331_v17  ;;  %v360_v43 = vadd.s32 3, %v356_v42 }
 0x185   : > { %v464_v19 = vmin.u32 %v333_v18, %v331_v17  ;;  %v361_v44 = vand.u32 3, %v360_v43 }
 0x187   : > { %v335_v20 = vclz %v464_v19  ;;  %vm366_vm13 = vcmp.eq.s32.totalorder %v361_v44, 2  ;;  %vm363_vm14 = vcmp.eq.s32.totalorder %v361_v44, 0  ;;  %vm362_vm15 = vcmp.lt.s32.totalorder %v361_v44, 2 }
 0x189   : > { %v465_v22 = vadd.s32 4294967294, %v335_v20 }
 0x18b   : > { %vm466_vm10 = vcmp.lt.s32.totalorder %v465_v22, 0 }
 0x18c   : > { %v338_v23 = vsel %vm466_vm10, 0, %v465_v22 }
 0x18d   : > { %v339_v25 = vsub.s32 32, %v338_v23  ;;  %v343_v26 = vsub.s32 4294967266, %v338_v23  ;;  %v340_v27 = vshll.u32 %v331_v17, %v338_v23 }
 0x18f   : > { %v341_v29 = vshrl.u32 %v323_v24, %v339_v25  ;;  %v344_v30 = vadd.s32 127, %v343_v26 }
 0x191   : > { %v342_v31 = vor.u32 %v341_v29, %v340_v27  ;;  %v345_v32 = vshll.u32 %v344_v30, 23 }
 0x193   : > { %v346_v33 = vor.u32 4788187, %v345_v32  ;;  %v349_v35 = vcvt.s32.f32 %v342_v31 }
 0x195   : > { %v347_v34 = vand.u32 2147483647, %v346_v33 }
 0x197   : > { %v350_v36 = vmul.f32 %v349_v35, %v347_v34 }
 0x199   : > { %v351_v37 = vxor.u32 2147483648, %v350_v36 }
 0x19b   : > { %v352_v39 = vsel %vm269_vm11, %v351_v37, %v350_v36 }
 0x19c   : > { %v355_v40 = vsel %vm268_vm12, %v707_v21, %v352_v39 }
 0x19d   : > { %542 = vcosq.f32 %v355_v40 }
 0x19e   : > { %544 = vsinq.f32 %v355_v40 }
 0x1aa   : > { %v543_v45 = vpop.eup %542 }
 0x1ab   : > { %v545_v46 = vpop.eup %544  ;;  %v367_v47 = vxor.u32 2147483648, %v543_v45 }
 0x1ac   : > { %v364_v48 = vxor.u32 2147483648, %v545_v46 }
 0x1ad   : > { %v368_v49 = vsel %vm366_vm13, %v367_v47, %v545_v46 }
 0x1ae   : > { %v365_v28 = vsel %vm363_vm14, %v543_v45, %v364_v48 }
 0x1af   : > { %v369_v51 = vsel %vm362_vm15, %v365_v28, %v368_v49 }
 0x1b0   : > { %v370_v52 = vsel %vm359_vm0, nan, %v369_v51 }
 0x1b1   : > { %v376_v53 = vmul.f32 %v467_v50, %v370_v52 }
 0x1b3   : > { %377 = vst [vmem:[%s161_s28] sm:$0xff] %v376_v53 }
 0x1b4   : > { %559 = shalt.err (!%p556_p3)
}
 0x1b5   : > { %s560_s10 = scalar_lea.hbm %s390_s5, 128  ;;  %s564_s19 = scalar_lea.hbm %s768_s3, 512 }
 0x1b6   : > { %p561_p4 = scmp.ne.s32.totalorder %s390_s5, %s560_s10  ;;  %p565_p9 = scmp.lt.s32.totalorder %s390_s5, %s768_s3 }
 0x1b7   : > { %p566_p10 = scmp.lt.s32.totalorder %s564_s19, %s560_s10 }
 0x1b8   : > { %p562_p7 = pnand %p561_p4, %p677_p5 }
 0x1b9   : > { %p567_p11 = por %p566_p10, %p565_p9 }
 0x1ba   : > { %p563_p8 = pneg %p562_p7 }
 0x1bc   : > { %p568_p12 = pnand %p567_p11, %p563_p8 }
 0x1be   : > { %571 = shalt.err (!%p568_p12)
}
 0x1bf   : > { %490 = dma.vmem_to_hbm [thread:$0]  (%p677_p5), %s393_s29, 128, %s390_s5, %s379_s6  }
 0x1c0 PF: > { %p496_p13 = scmp.ge.s32.totalorder %s606_s15, 2  ;;  %s404_s25 = sand.u32 1, %s594_s12  }
 0x1c1   : > { %s405_s26 = scalar_lea.sflag [#allocation3], %s404_s25 }
 0x1c2   : > { %p493_p0 = pnand %p496_p13, %p681_p6 }
 0x1c4   : > { %p494_p1 = pneg %p493_p0 }
 0x1c6   : > { %589 = dma.done.wait (%p494_p1), %s405_s26, 128  }
 0x1c7   : > { %591 = vsyncadd (%p494_p1), %s405_s26, 4294967168  ;;  %p13_p2 = scmp.ge.s32.totalorder %s664_s18, 6   ;;  %s771_s12 = smov %s598_s13 }
 0x1c8   : > { %s772_s13 = smov %s602_s14  ;;  %s773_s14 = smov %s675_s21 }
 0x1c9   : > { %s774_s15 = smov %s664_s18  ;;  %15 = sbr.rel (!%p13_p2) target bundleno = 3 (0x3), region = 67 }
 0x1ce   :  { %410 = vsyncpa [#allocation3], 1 }
 0x1cf   :  { %412 = vsyncpa [#allocation3 + $0x1], 1 }

</bundles_post_ra>
